<compile_context>
chip_gen: v7x
topology: tpu7x:2x2x1
jax: 0.10.0
libtpu: 0.0.40
codegen_flags: <defaults>
</compile_context>

<pallas_src>
import functools

import jax
import jax.numpy as jnp
import numpy as np
from jax import lax
from jax.experimental import pallas as pl
from jax.experimental.pallas import tpu as pltpu

BN_EPS = 1e-5
_LANE = 128
_SUBLANE = 8


def _round_up(x, m):
    return (x + m - 1) // m * m


# ---------------- Kernel 1: 3x3 conv + per-block BN partial stats ----------------
def _conv3x3_stats_kernel(x_ref, w_ref, b_ref, ml_ref, mr_ref,
                          y_ref, ssum_ref, ssq_ref,
                          xw_ref, patch_ref, *, W, pad):
    # x_ref:    (nb, Cinp, HW)   nb batch elements, H*W flattened on lanes
    # w_ref:    (Cout, 9*Cinp)   columns ordered (kh, kw, c)
    # b_ref:    (Cout, 1)
    # ml_ref:   (1, HW)  1.0 where the (w-1) column neighbour is in-bounds
    # mr_ref:   (1, HW)  1.0 where the (w+1) column neighbour is in-bounds
    # y_ref:    (nb, Cout, HW)   conv output (lane-dense)
    # ssum_ref: (1, Cout, 1)     per-block per-channel sum
    # ssq_ref:  (1, Cout, 1)     per-block per-channel sum of squares
    # xw_ref:   (Cinp, pad + HW + pad) zero-haloed flat image (VMEM scratch)
    # patch_ref:(9*Cinp, nb*HW)  im2col patch matrix (VMEM scratch)
    nb, cinp, hw = x_ref.shape

    ml = ml_ref[...]          # (1, HW), broadcasts over sublanes
    mr = mr_ref[...]

    # Zero the halos once per grid step; only the middle [pad, pad+hw) window
    # is overwritten per batch element, so the halos stay zero for all nb.
    xw_ref[:, :pad] = jnp.zeros((cinp, pad), jnp.float32)
    xw_ref[:, pad + hw:2 * pad + hw] = jnp.zeros((cinp, pad), jnp.float32)

    for b in range(nb):
        xw_ref[:, pad:pad + hw] = x_ref[b]        # lane-aligned store
        col = b * hw                               # multiple of HW (>=128-aligned)
        # im2col: 9 statically shifted views -> columns [col, col+hw) of patch.
        for kh in range(3):
            for kw in range(3):
                start = pad + (kh - 1) * W + (kw - 1)      # static lane offset
                tap = xw_ref[:, start:start + hw]          # (Cinp, HW)
                if kw == 0:
                    tap = tap * ml
                elif kw == 2:
                    tap = tap * mr
                row = (kh * 3 + kw) * cinp                 # multiple of Cinp (sublane-aligned)
                patch_ref[row:row + cinp, col:col + hw] = tap

    # Single fat MXU matmul: (Cout, 9*Cinp) x (9*Cinp, nb*HW) -> (Cout, nb*HW).
    y = jnp.dot(w_ref[...], patch_ref[...], preferred_element_type=jnp.float32)
    y = y + b_ref[...]                                     # (Cout, 1) broadcast

    for b in range(nb):
        y_ref[b] = y[:, b * hw:(b + 1) * hw]               # lane-aligned slices

    # Fused per-channel BN partial statistics (no HBM re-read of y for stats).
    ssum_ref[0] = jnp.sum(y, axis=1, keepdims=True)        # (Cout, 1)
    ssq_ref[0] = jnp.sum(y * y, axis=1, keepdims=True)


def _conv_batch_tile(N, cinp, cout, hw, budget=12 << 20):
    # patch scratch + double-buffered x block + double-buffered y block, per batch elem
    per = (9 * cinp + 2 * cinp + 2 * cout) * hw * 4
    nb = int(max(1, min(N, budget // max(per, 1))))
    nb = min(nb, 16)              # bound static unrolling inside the kernel
    while N % nb:
        nb -= 1
    return nb


def _conv3x3_with_stats(x_flat, w2d, bias, mask_l, mask_r, *, W):
    N, cinp, hw = x_flat.shape
    cout, kcols = w2d.shape
    pad = _round_up(W + 1, _LANE)
    nb = _conv_batch_tile(N, cinp, cout, hw)
    gN = N // nb
    kernel = functools.partial(_conv3x3_stats_kernel, W=W, pad=pad)
    return pl.pallas_call(
        kernel,
        out_shape=(
            jax.ShapeDtypeStruct((N, cout, hw), jnp.float32),
            jax.ShapeDtypeStruct((gN, cout, 1), jnp.float32),
            jax.ShapeDtypeStruct((gN, cout, 1), jnp.float32),
        ),
        grid=(gN,),
        in_specs=[
            pl.BlockSpec((nb, cinp, hw), lambda n: (n, 0, 0)),
            pl.BlockSpec((cout, kcols), lambda n: (0, 0)),
            pl.BlockSpec((cout, 1), lambda n: (0, 0)),
            pl.BlockSpec((1, hw), lambda n: (0, 0)),
            pl.BlockSpec((1, hw), lambda n: (0, 0)),
        ],
        out_specs=(
            pl.BlockSpec((nb, cout, hw), lambda n: (n, 0, 0)),
            pl.BlockSpec((1, cout, 1), lambda n: (n, 0, 0)),
            pl.BlockSpec((1, cout, 1), lambda n: (n, 0, 0)),
        ),
        scratch_shapes=[
            pltpu.VMEM((cinp, 2 * pad + hw), jnp.float32),   # haloed image
            pltpu.VMEM((9 * cinp, nb * hw), jnp.float32),    # patch matrix
        ],
        compiler_params=pltpu.CompilerParams(
            dimension_semantics=("parallel",),
            vmem_limit_bytes=32 * 1024 * 1024),
    )(x_flat, w2d, bias, mask_l, mask_r)


# ---------------- Kernel 2: normalize (folded scale/shift) + ReLU ----------------
def _bn_relu_kernel(y_ref, scale_ref, shift_ref, o_ref):
    # (y - mean) * rsqrt(var + eps) * gamma + beta  ==  y * scale + shift
    o_ref[...] = jnp.maximum(y_ref[...] * scale_ref[...] + shift_ref[...], 0.0)


def _spatial_tile(hw, cap=2048):
    if hw % _LANE:
        return hw
    t = min(hw, cap) // _LANE * _LANE
    while hw % t:
        t -= _LANE
    return t


def _bn_batch_tile(N, cout, t_hw, budget=8 << 20):
    per = 4 * cout * t_hw * 4          # in + out, double-buffered
    nb = int(max(1, min(N, budget // max(per, 1))))
    while N % nb:
        nb -= 1
    return nb


def _bn_relu(y_flat, scale, shift):
    N, cout, hw = y_flat.shape
    t_hw = _spatial_tile(hw)
    nb = _bn_batch_tile(N, cout, t_hw)
    return pl.pallas_call(
        _bn_relu_kernel,
        out_shape=jax.ShapeDtypeStruct((N, cout, hw), jnp.float32),
        grid=(N // nb, hw // t_hw),
        in_specs=[
            pl.BlockSpec((nb, cout, t_hw), lambda n, s: (n, 0, s)),
            pl.BlockSpec((cout, 1), lambda n, s: (0, 0)),
            pl.BlockSpec((cout, 1), lambda n, s: (0, 0)),
        ],
        out_specs=pl.BlockSpec((nb, cout, t_hw), lambda n, s: (n, 0, s)),
        compiler_params=pltpu.CompilerParams(
            dimension_semantics=("parallel", "parallel"),
            vmem_limit_bytes=32 * 1024 * 1024),
    )(y_flat, scale, shift)


# ---------------- Layer wrapper (NCHW in / NCHW out) ----------------
def layer_forward(x_nchw, w_oihw, bias, gamma, beta):
    N, cin, H, W = x_nchw.shape
    cout = w_oihw.shape[0]
    assert w_oihw.shape[2] == 3 and w_oihw.shape[3] == 3, "kernel expects 3x3 conv"
    hw = H * W

    # Flattened-spatial-on-lanes layout: pure reshapes, no activation transposes.
    # Cin is zero-padded up to the f32 sublane tile (8) so the in-kernel im2col
    # stores stay tile-aligned; this pad is tiny (input only).
    cinp = _round_up(cin, _SUBLANE)
    x_flat = x_nchw.reshape(N, cin, hw).astype(jnp.float32)
    if cinp != cin:
        x_flat = jnp.pad(x_flat, ((0, 0), (0, cinp - cin), (0, 0)))

    # Weights: (Cout, Cin, 3, 3) -> (Cout, 9*Cinp), column order (kh, kw, c)
    # matching the patch-matrix rows.  Tiny one-time transform outside kernels.
    w_pad = jnp.pad(w_oihw.astype(jnp.float32),
                    ((0, 0), (0, cinp - cin), (0, 0), (0, 0)))
    w2d = jnp.transpose(w_pad, (0, 2, 3, 1)).reshape(cout, 9 * cinp)

    # Host-side constant lane masks killing the w-1 / w+1 column wrap-around.
    wpos = np.arange(hw, dtype=np.int32) % W
    mask_l = jnp.asarray(wpos >= 1, dtype=jnp.float32).reshape(1, hw)
    mask_r = jnp.asarray(wpos <= W - 2, dtype=jnp.float32).reshape(1, hw)

    y, ssum, ssq = _conv3x3_with_stats(
        x_flat, w2d, bias.reshape(cout, 1).astype(jnp.float32),
        mask_l, mask_r, W=W)

    # Finish the tiny per-channel BN statistics (train-mode batch stats,
    # biased variance, as PyTorch BN normalization uses).  Single-pass
    # sum/sumsq is fine at these sizes; use Welford for very large N*H*W.
    count = N * hw
    mean = jnp.sum(ssum[:, :, 0], axis=0) / count
    var = jnp.sum(ssq[:, :, 0], axis=0) / count - mean * mean
    inv = lax.rsqrt(var + BN_EPS)
    scale = (gamma * inv).reshape(cout, 1).astype(jnp.float32)
    shift = (beta - mean * gamma * inv).reshape(cout, 1).astype(jnp.float32)
    # TODO(synk): BatchNorm2d running_mean/running_var buffer updates are
    # training-side state and are not emitted (forward output is unaffected).

    z = _bn_relu(y, scale, shift)
    return z.reshape(N, cout, H, W)


# ---------------- Pure-JAX reference (sanity check) ----------------
def layer_reference(x_nchw, w_oihw, bias, gamma, beta):
    y = lax.conv_general_dilated(
        x_nchw, w_oihw, window_strides=(1, 1), padding=((1, 1), (1, 1)),
        dimension_numbers=("NCHW", "OIHW", "NCHW"))
    y = y + bias[None, :, None, None]
    mean = jnp.mean(y, axis=(0, 2, 3), keepdims=True)
    var = jnp.mean((y - mean) ** 2, axis=(0, 2, 3), keepdims=True)
    z = (y - mean) * lax.rsqrt(var + BN_EPS)
    z = z * gamma[None, :, None, None] + beta[None, :, None, None]
    return jnp.maximum(z, 0.0)


if __name__ == "__main__":
    N, Cin, H, W = 2, 4, 16, 16
    Cout, K = 8, 3

    key = jax.random.PRNGKey(0)
    kx, kw, kb = jax.random.split(key, 3)

    x = jax.random.normal(kx, (N, Cin, H, W), dtype=jnp.float32)
    w = jax.random.normal(kw, (Cout, Cin, K, K), dtype=jnp.float32) * 0.1
    b = jax.random.normal(kb, (Cout,), dtype=jnp.float32) * 0.1
    gamma = jnp.ones((Cout,), dtype=jnp.float32)   # nn.BatchNorm2d weight init
    beta = jnp.zeros((Cout,), dtype=jnp.float32)   # nn.BatchNorm2d bias init

    out = jax.block_until_ready(layer_forward(x, w, b, gamma, beta))
    ref = layer_reference(x, w, b, gamma, beta)

    assert out.shape == (N, Cout, H, W)
    assert jnp.allclose(out, ref, atol=1e-4, rtol=1e-4), "mismatch vs reference"

    print("KERNEL_OK")
</pallas_src>

<mosaic_0001>
module attributes {stable_mosaic.version = 11 : i64} {
  func.func @_conv3x3_stats_kernel(%arg0: i32, %arg1: memref<2x8x256xf32, #tpu.memory_space<vmem>>, %arg2: memref<8x72xf32, #tpu.memory_space<vmem>>, %arg3: memref<8x1xf32, #tpu.memory_space<vmem>>, %arg4: memref<1x256xf32, #tpu.memory_space<vmem>>, %arg5: memref<1x256xf32, #tpu.memory_space<vmem>>, %arg6: memref<2x8x256xf32, #tpu.memory_space<vmem>>, %arg7: memref<1x8x1xf32, #tpu.memory_space<vmem>>, %arg8: memref<1x8x1xf32, #tpu.memory_space<vmem>>, %arg9: memref<8x512xf32, #tpu.memory_space<vmem>>, %arg10: memref<72x512xf32, #tpu.memory_space<vmem>>) attributes {dimension_semantics = [#tpu.dimension_semantics<parallel>], iteration_bounds = array<i64: 1>, scalar_prefetch = 0 : i64, scratch_operands = 2 : i64, tpu.core_type = #tpu.core_type<tc>, window_params = [{transform_indices = @transform_0, window_bounds = array<i64: 2, 8, 256>}, {pipeline_mode = #tpu.pipeline_mode<synchronous>, transform_indices = @transform_1, window_bounds = array<i64: 8, 72>}, {pipeline_mode = #tpu.pipeline_mode<synchronous>, transform_indices = @transform_2, window_bounds = array<i64: 8, 1>}, {pipeline_mode = #tpu.pipeline_mode<synchronous>, transform_indices = @transform_3, window_bounds = array<i64: 1, 256>}, {pipeline_mode = #tpu.pipeline_mode<synchronous>, transform_indices = @transform_4, window_bounds = array<i64: 1, 256>}, {transform_indices = @transform_5, window_bounds = array<i64: 2, 8, 256>}, {transform_indices = @transform_6, window_bounds = array<i64: 1, 8, 1>}, {transform_indices = @transform_7, window_bounds = array<i64: 1, 8, 1>}]} {
    %c0 = arith.constant 0 : index
    %c0_0 = arith.constant 0 : index
    %0 = vector.load %arg4[%c0, %c0_0] : memref<1x256xf32, #tpu.memory_space<vmem>>, vector<1x256xf32>
    %c0_1 = arith.constant 0 : index
    %c0_2 = arith.constant 0 : index
    %1 = vector.load %arg5[%c0_1, %c0_2] : memref<1x256xf32, #tpu.memory_space<vmem>>, vector<1x256xf32>
    %cst = arith.constant 0.000000e+00 : f32
    %2 = vector.broadcast %cst : f32 to vector<8x128xf32>
    %c0_3 = arith.constant 0 : index
    %c0_4 = arith.constant 0 : index
    %3 = vector.load %arg9[%c0_3, %c0_4] : memref<8x512xf32, #tpu.memory_space<vmem>>, vector<8x128xf32>
    tpu.vector_store %arg9[%c0_3, %c0_4], %2 {strides = array<i32>} : memref<8x512xf32, #tpu.memory_space<vmem>>, vector<8x128xf32>,
    %cst_5 = arith.constant 0.000000e+00 : f32
    %4 = vector.broadcast %cst_5 : f32 to vector<8x128xf32>
    %c0_6 = arith.constant 0 : index
    %c384 = arith.constant 384 : index
    %5 = vector.load %arg9[%c0_6, %c384] : memref<8x512xf32, #tpu.memory_space<vmem>>, vector<8x128xf32>
    tpu.vector_store %arg9[%c0_6, %c384], %4 {strides = array<i32>} : memref<8x512xf32, #tpu.memory_space<vmem>>, vector<8x128xf32>,
    %c0_7 = arith.constant 0 : index
    %c0_8 = arith.constant 0 : index
    %c0_9 = arith.constant 0 : index
    %6 = vector.load %arg1[%c0_7, %c0_8, %c0_9] : memref<2x8x256xf32, #tpu.memory_space<vmem>>, vector<1x8x256xf32>
    %7 = vector.shape_cast %6 : vector<1x8x256xf32> to vector<8x256xf32>
    %c0_10 = arith.constant 0 : index
    %c128 = arith.constant 128 : index
    %8 = vector.load %arg9[%c0_10, %c128] : memref<8x512xf32, #tpu.memory_space<vmem>>, vector<8x256xf32>
    tpu.vector_store %arg9[%c0_10, %c128], %7 {strides = array<i32>} : memref<8x512xf32, #tpu.memory_space<vmem>>, vector<8x256xf32>,
    %c0_11 = arith.constant 0 : index
    %c111 = arith.constant 111 : index
    %9 = vector.load %arg9[%c0_11, %c111] : memref<8x512xf32, #tpu.memory_space<vmem>>, vector<8x256xf32>
    %10 = vector.broadcast %0 : vector<1x256xf32> to vector<8x256xf32>
    %11 = arith.mulf %9, %10 : vector<8x256xf32>
    %c0_12 = arith.constant 0 : index
    %c0_13 = arith.constant 0 : index
    %12 = vector.load %arg10[%c0_12, %c0_13] : memref<72x512xf32, #tpu.memory_space<vmem>>, vector<8x256xf32>
    tpu.vector_store %arg10[%c0_12, %c0_13], %11 {strides = array<i32>} : memref<72x512xf32, #tpu.memory_space<vmem>>, vector<8x256xf32>,
    %c0_14 = arith.constant 0 : index
    %c112 = arith.constant 112 : index
    %13 = vector.load %arg9[%c0_14, %c112] : memref<8x512xf32, #tpu.memory_space<vmem>>, vector<8x256xf32>
    %c8 = arith.constant 8 : index
    %c0_15 = arith.constant 0 : index
    %14 = vector.load %arg10[%c8, %c0_15] : memref<72x512xf32, #tpu.memory_space<vmem>>, vector<8x256xf32>
    tpu.vector_store %arg10[%c8, %c0_15], %13 {strides = array<i32>} : memref<72x512xf32, #tpu.memory_space<vmem>>, vector<8x256xf32>,
    %c0_16 = arith.constant 0 : index
    %c113 = arith.constant 113 : index
    %15 = vector.load %arg9[%c0_16, %c113] : memref<8x512xf32, #tpu.memory_space<vmem>>, vector<8x256xf32>
    %16 = vector.broadcast %1 : vector<1x256xf32> to vector<8x256xf32>
    %17 = arith.mulf %15, %16 : vector<8x256xf32>
    %c16 = arith.constant 16 : index
    %c0_17 = arith.constant 0 : index
    %18 = vector.load %arg10[%c16, %c0_17] : memref<72x512xf32, #tpu.memory_space<vmem>>, vector<8x256xf32>
    tpu.vector_store %arg10[%c16, %c0_17], %17 {strides = array<i32>} : memref<72x512xf32, #tpu.memory_space<vmem>>, vector<8x256xf32>,
    %c0_18 = arith.constant 0 : index
    %c127 = arith.constant 127 : index
    %19 = vector.load %arg9[%c0_18, %c127] : memref<8x512xf32, #tpu.memory_space<vmem>>, vector<8x256xf32>
    %20 = vector.broadcast %0 : vector<1x256xf32> to vector<8x256xf32>
    %21 = arith.mulf %19, %20 : vector<8x256xf32>
    %c24 = arith.constant 24 : index
    %c0_19 = arith.constant 0 : index
    %22 = vector.load %arg10[%c24, %c0_19] : memref<72x512xf32, #tpu.memory_space<vmem>>, vector<8x256xf32>
    tpu.vector_store %arg10[%c24, %c0_19], %21 {strides = array<i32>} : memref<72x512xf32, #tpu.memory_space<vmem>>, vector<8x256xf32>,
    %c0_20 = arith.constant 0 : index
    %c128_21 = arith.constant 128 : index
    %23 = vector.load %arg9[%c0_20, %c128_21] : memref<8x512xf32, #tpu.memory_space<vmem>>, vector<8x256xf32>
    %c32 = arith.constant 32 : index
    %c0_22 = arith.constant 0 : index
    %24 = vector.load %arg10[%c32, %c0_22] : memref<72x512xf32, #tpu.memory_space<vmem>>, vector<8x256xf32>
    tpu.vector_store %arg10[%c32, %c0_22], %23 {strides = array<i32>} : memref<72x512xf32, #tpu.memory_space<vmem>>, vector<8x256xf32>,
    %c0_23 = arith.constant 0 : index
    %c129 = arith.constant 129 : index
    %25 = vector.load %arg9[%c0_23, %c129] : memref<8x512xf32, #tpu.memory_space<vmem>>, vector<8x256xf32>
    %26 = vector.broadcast %1 : vector<1x256xf32> to vector<8x256xf32>
    %27 = arith.mulf %25, %26 : vector<8x256xf32>
    %c40 = arith.constant 40 : index
    %c0_24 = arith.constant 0 : index
    %28 = vector.load %arg10[%c40, %c0_24] : memref<72x512xf32, #tpu.memory_space<vmem>>, vector<8x256xf32>
    tpu.vector_store %arg10[%c40, %c0_24], %27 {strides = array<i32>} : memref<72x512xf32, #tpu.memory_space<vmem>>, vector<8x256xf32>,
    %c0_25 = arith.constant 0 : index
    %c143 = arith.constant 143 : index
    %29 = vector.load %arg9[%c0_25, %c143] : memref<8x512xf32, #tpu.memory_space<vmem>>, vector<8x256xf32>
    %30 = vector.broadcast %0 : vector<1x256xf32> to vector<8x256xf32>
    %31 = arith.mulf %29, %30 : vector<8x256xf32>
    %c48 = arith.constant 48 : index
    %c0_26 = arith.constant 0 : index
    %32 = vector.load %arg10[%c48, %c0_26] : memref<72x512xf32, #tpu.memory_space<vmem>>, vector<8x256xf32>
    tpu.vector_store %arg10[%c48, %c0_26], %31 {strides = array<i32>} : memref<72x512xf32, #tpu.memory_space<vmem>>, vector<8x256xf32>,
    %c0_27 = arith.constant 0 : index
    %c144 = arith.constant 144 : index
    %33 = vector.load %arg9[%c0_27, %c144] : memref<8x512xf32, #tpu.memory_space<vmem>>, vector<8x256xf32>
    %c56 = arith.constant 56 : index
    %c0_28 = arith.constant 0 : index
    %34 = vector.load %arg10[%c56, %c0_28] : memref<72x512xf32, #tpu.memory_space<vmem>>, vector<8x256xf32>
    tpu.vector_store %arg10[%c56, %c0_28], %33 {strides = array<i32>} : memref<72x512xf32, #tpu.memory_space<vmem>>, vector<8x256xf32>,
    %c0_29 = arith.constant 0 : index
    %c145 = arith.constant 145 : index
    %35 = vector.load %arg9[%c0_29, %c145] : memref<8x512xf32, #tpu.memory_space<vmem>>, vector<8x256xf32>
    %36 = vector.broadcast %1 : vector<1x256xf32> to vector<8x256xf32>
    %37 = arith.mulf %35, %36 : vector<8x256xf32>
    %c64 = arith.constant 64 : index
    %c0_30 = arith.constant 0 : index
    %38 = vector.load %arg10[%c64, %c0_30] : memref<72x512xf32, #tpu.memory_space<vmem>>, vector<8x256xf32>
    tpu.vector_store %arg10[%c64, %c0_30], %37 {strides = array<i32>} : memref<72x512xf32, #tpu.memory_space<vmem>>, vector<8x256xf32>,
    %c1 = arith.constant 1 : index
    %c0_31 = arith.constant 0 : index
    %c0_32 = arith.constant 0 : index
    %39 = vector.load %arg1[%c1, %c0_31, %c0_32] : memref<2x8x256xf32, #tpu.memory_space<vmem>>, vector<1x8x256xf32>
    %40 = vector.shape_cast %39 : vector<1x8x256xf32> to vector<8x256xf32>
    %c0_33 = arith.constant 0 : index
    %c128_34 = arith.constant 128 : index
    %41 = vector.load %arg9[%c0_33, %c128_34] : memref<8x512xf32, #tpu.memory_space<vmem>>, vector<8x256xf32>
    tpu.vector_store %arg9[%c0_33, %c128_34], %40 {strides = array<i32>} : memref<8x512xf32, #tpu.memory_space<vmem>>, vector<8x256xf32>,
    %c0_35 = arith.constant 0 : index
    %c111_36 = arith.constant 111 : index
    %42 = vector.load %arg9[%c0_35, %c111_36] : memref<8x512xf32, #tpu.memory_space<vmem>>, vector<8x256xf32>
    %43 = vector.broadcast %0 : vector<1x256xf32> to vector<8x256xf32>
    %44 = arith.mulf %42, %43 : vector<8x256xf32>
    %c0_37 = arith.constant 0 : index
    %c256 = arith.constant 256 : index
    %45 = vector.load %arg10[%c0_37, %c256] : memref<72x512xf32, #tpu.memory_space<vmem>>, vector<8x256xf32>
    tpu.vector_store %arg10[%c0_37, %c256], %44 {strides = array<i32>} : memref<72x512xf32, #tpu.memory_space<vmem>>, vector<8x256xf32>,
    %c0_38 = arith.constant 0 : index
    %c112_39 = arith.constant 112 : index
    %46 = vector.load %arg9[%c0_38, %c112_39] : memref<8x512xf32, #tpu.memory_space<vmem>>, vector<8x256xf32>
    %c8_40 = arith.constant 8 : index
    %c256_41 = arith.constant 256 : index
    %47 = vector.load %arg10[%c8_40, %c256_41] : memref<72x512xf32, #tpu.memory_space<vmem>>, vector<8x256xf32>
    tpu.vector_store %arg10[%c8_40, %c256_41], %46 {strides = array<i32>} : memref<72x512xf32, #tpu.memory_space<vmem>>, vector<8x256xf32>,
    %c0_42 = arith.constant 0 : index
    %c113_43 = arith.constant 113 : index
    %48 = vector.load %arg9[%c0_42, %c113_43] : memref<8x512xf32, #tpu.memory_space<vmem>>, vector<8x256xf32>
    %49 = vector.broadcast %1 : vector<1x256xf32> to vector<8x256xf32>
    %50 = arith.mulf %48, %49 : vector<8x256xf32>
    %c16_44 = arith.constant 16 : index
    %c256_45 = arith.constant 256 : index
    %51 = vector.load %arg10[%c16_44, %c256_45] : memref<72x512xf32, #tpu.memory_space<vmem>>, vector<8x256xf32>
    tpu.vector_store %arg10[%c16_44, %c256_45], %50 {strides = array<i32>} : memref<72x512xf32, #tpu.memory_space<vmem>>, vector<8x256xf32>,
    %c0_46 = arith.constant 0 : index
    %c127_47 = arith.constant 127 : index
    %52 = vector.load %arg9[%c0_46, %c127_47] : memref<8x512xf32, #tpu.memory_space<vmem>>, vector<8x256xf32>
    %53 = vector.broadcast %0 : vector<1x256xf32> to vector<8x256xf32>
    %54 = arith.mulf %52, %53 : vector<8x256xf32>
    %c24_48 = arith.constant 24 : index
    %c256_49 = arith.constant 256 : index
    %55 = vector.load %arg10[%c24_48, %c256_49] : memref<72x512xf32, #tpu.memory_space<vmem>>, vector<8x256xf32>
    tpu.vector_store %arg10[%c24_48, %c256_49], %54 {strides = array<i32>} : memref<72x512xf32, #tpu.memory_space<vmem>>, vector<8x256xf32>,
    %c0_50 = arith.constant 0 : index
    %c128_51 = arith.constant 128 : index
    %56 = vector.load %arg9[%c0_50, %c128_51] : memref<8x512xf32, #tpu.memory_space<vmem>>, vector<8x256xf32>
    %c32_52 = arith.constant 32 : index
    %c256_53 = arith.constant 256 : index
    %57 = vector.load %arg10[%c32_52, %c256_53] : memref<72x512xf32, #tpu.memory_space<vmem>>, vector<8x256xf32>
    tpu.vector_store %arg10[%c32_52, %c256_53], %56 {strides = array<i32>} : memref<72x512xf32, #tpu.memory_space<vmem>>, vector<8x256xf32>,
    %c0_54 = arith.constant 0 : index
    %c129_55 = arith.constant 129 : index
    %58 = vector.load %arg9[%c0_54, %c129_55] : memref<8x512xf32, #tpu.memory_space<vmem>>, vector<8x256xf32>
    %59 = vector.broadcast %1 : vector<1x256xf32> to vector<8x256xf32>
    %60 = arith.mulf %58, %59 : vector<8x256xf32>
    %c40_56 = arith.constant 40 : index
    %c256_57 = arith.constant 256 : index
    %61 = vector.load %arg10[%c40_56, %c256_57] : memref<72x512xf32, #tpu.memory_space<vmem>>, vector<8x256xf32>
    tpu.vector_store %arg10[%c40_56, %c256_57], %60 {strides = array<i32>} : memref<72x512xf32, #tpu.memory_space<vmem>>, vector<8x256xf32>,
    %c0_58 = arith.constant 0 : index
    %c143_59 = arith.constant 143 : index
    %62 = vector.load %arg9[%c0_58, %c143_59] : memref<8x512xf32, #tpu.memory_space<vmem>>, vector<8x256xf32>
    %63 = vector.broadcast %0 : vector<1x256xf32> to vector<8x256xf32>
    %64 = arith.mulf %62, %63 : vector<8x256xf32>
    %c48_60 = arith.constant 48 : index
    %c256_61 = arith.constant 256 : index
    %65 = vector.load %arg10[%c48_60, %c256_61] : memref<72x512xf32, #tpu.memory_space<vmem>>, vector<8x256xf32>
    tpu.vector_store %arg10[%c48_60, %c256_61], %64 {strides = array<i32>} : memref<72x512xf32, #tpu.memory_space<vmem>>, vector<8x256xf32>,
    %c0_62 = arith.constant 0 : index
    %c144_63 = arith.constant 144 : index
    %66 = vector.load %arg9[%c0_62, %c144_63] : memref<8x512xf32, #tpu.memory_space<vmem>>, vector<8x256xf32>
    %c56_64 = arith.constant 56 : index
    %c256_65 = arith.constant 256 : index
    %67 = vector.load %arg10[%c56_64, %c256_65] : memref<72x512xf32, #tpu.memory_space<vmem>>, vector<8x256xf32>
    tpu.vector_store %arg10[%c56_64, %c256_65], %66 {strides = array<i32>} : memref<72x512xf32, #tpu.memory_space<vmem>>, vector<8x256xf32>,
    %c0_66 = arith.constant 0 : index
    %c145_67 = arith.constant 145 : index
    %68 = vector.load %arg9[%c0_66, %c145_67] : memref<8x512xf32, #tpu.memory_space<vmem>>, vector<8x256xf32>
    %69 = vector.broadcast %1 : vector<1x256xf32> to vector<8x256xf32>
    %70 = arith.mulf %68, %69 : vector<8x256xf32>
    %c64_68 = arith.constant 64 : index
    %c256_69 = arith.constant 256 : index
    %71 = vector.load %arg10[%c64_68, %c256_69] : memref<72x512xf32, #tpu.memory_space<vmem>>, vector<8x256xf32>
    tpu.vector_store %arg10[%c64_68, %c256_69], %70 {strides = array<i32>} : memref<72x512xf32, #tpu.memory_space<vmem>>, vector<8x256xf32>,
    %c0_70 = arith.constant 0 : index
    %c0_71 = arith.constant 0 : index
    %72 = vector.load %arg2[%c0_70, %c0_71] : memref<8x72xf32, #tpu.memory_space<vmem>>, vector<8x72xf32>
    %c0_72 = arith.constant 0 : index
    %c0_73 = arith.constant 0 : index
    %73 = vector.load %arg10[%c0_72, %c0_73] : memref<72x512xf32, #tpu.memory_space<vmem>>, vector<72x512xf32>
    %cst_74 = arith.constant dense<0.000000e+00> : vector<8x512xf32>
    %74 = tpu.matmul %72, %73, %cst_74 {dimension_numbers = #tpu.dot_dimension_numbers<[1], [0], [0], [1], [0, 0, 1, 1], [], []>} : vector<8x72xf32>, vector<72x512xf32>, vector<8x512xf32> -> vector<8x512xf32>
    %c0_75 = arith.constant 0 : index
    %c0_76 = arith.constant 0 : index
    %75 = vector.load %arg3[%c0_75, %c0_76] : memref<8x1xf32, #tpu.memory_space<vmem>>, vector<8x1xf32>
    %76 = vector.broadcast %75 : vector<8x1xf32> to vector<8x512xf32>
    %77 = arith.addf %74, %76 : vector<8x512xf32>
    %78 = vector.extract_strided_slice %77 {offsets = [0, 0], sizes = [8, 256], strides = [1, 1]} : vector<8x512xf32> to vector<8x256xf32>
    %c0_77 = arith.constant 0 : index
    %c0_78 = arith.constant 0 : index
    %c0_79 = arith.constant 0 : index
    %79 = vector.load %arg6[%c0_77, %c0_78, %c0_79] : memref<2x8x256xf32, #tpu.memory_space<vmem>>, vector<1x8x256xf32>
    %80 = vector.shape_cast %79 : vector<1x8x256xf32> to vector<8x256xf32>
    %81 = vector.shape_cast %78 : vector<8x256xf32> to vector<1x8x256xf32>
    tpu.vector_store %arg6[%c0_77, %c0_78, %c0_79], %81 {strides = array<i32>} : memref<2x8x256xf32, #tpu.memory_space<vmem>>, vector<1x8x256xf32>,
    %82 = vector.extract_strided_slice %77 {offsets = [0, 256], sizes = [8, 256], strides = [1, 1]} : vector<8x512xf32> to vector<8x256xf32>
    %c1_80 = arith.constant 1 : index
    %c0_81 = arith.constant 0 : index
    %c0_82 = arith.constant 0 : index
    %83 = vector.load %arg6[%c1_80, %c0_81, %c0_82] : memref<2x8x256xf32, #tpu.memory_space<vmem>>, vector<1x8x256xf32>
    %84 = vector.shape_cast %83 : vector<1x8x256xf32> to vector<8x256xf32>
    %85 = vector.shape_cast %82 : vector<8x256xf32> to vector<1x8x256xf32>
    tpu.vector_store %arg6[%c1_80, %c0_81, %c0_82], %85 {strides = array<i32>} : memref<2x8x256xf32, #tpu.memory_space<vmem>>, vector<1x8x256xf32>,
    %cst_83 = arith.constant dense<0.000000e+00> : vector<8xf32>
    %86 = vector.multi_reduction <add>, %77, %cst_83 [1] : vector<8x512xf32> to vector<8xf32>
    %87 = vector.shape_cast %86 : vector<8xf32> to vector<8x1xf32>
    %c0_84 = arith.constant 0 : index
    %c0_85 = arith.constant 0 : index
    %c0_86 = arith.constant 0 : index
    %88 = vector.load %arg7[%c0_84, %c0_85, %c0_86] : memref<1x8x1xf32, #tpu.memory_space<vmem>>, vector<1x8x1xf32>
    %89 = vector.shape_cast %88 : vector<1x8x1xf32> to vector<8x1xf32>
    %90 = vector.shape_cast %87 : vector<8x1xf32> to vector<1x8x1xf32>
    tpu.vector_store %arg7[%c0_84, %c0_85, %c0_86], %90 {strides = array<i32>} : memref<1x8x1xf32, #tpu.memory_space<vmem>>, vector<1x8x1xf32>,
    %91 = arith.mulf %77, %77 : vector<8x512xf32>
    %cst_87 = arith.constant dense<0.000000e+00> : vector<8xf32>
    %92 = vector.multi_reduction <add>, %91, %cst_87 [1] : vector<8x512xf32> to vector<8xf32>
    %93 = vector.shape_cast %92 : vector<8xf32> to vector<8x1xf32>
    %c0_88 = arith.constant 0 : index
    %c0_89 = arith.constant 0 : index
    %c0_90 = arith.constant 0 : index
    %94 = vector.load %arg8[%c0_88, %c0_89, %c0_90] : memref<1x8x1xf32, #tpu.memory_space<vmem>>, vector<1x8x1xf32>
    %95 = vector.shape_cast %94 : vector<1x8x1xf32> to vector<8x1xf32>
    %96 = vector.shape_cast %93 : vector<8x1xf32> to vector<1x8x1xf32>
    tpu.vector_store %arg8[%c0_88, %c0_89, %c0_90], %96 {strides = array<i32>} : memref<1x8x1xf32, #tpu.memory_space<vmem>>, vector<1x8x1xf32>,
    return
  }
  func.func @transform_0(%arg0: i32) -> (i32, i32, i32) {
    %c0_i32 = arith.constant 0 : i32
    %c0_i32_0 = arith.constant 0 : i32
    %c0_i32_1 = arith.constant 0 : i32
    return %arg0, %c0_i32, %c0_i32_0 : i32, i32, i32
  }
  func.func @transform_1(%arg0: i32) -> (i32, i32) {
    %c0_i32 = arith.constant 0 : i32
    %c0_i32_0 = arith.constant 0 : i32
    %c0_i32_1 = arith.constant 0 : i32
    return %c0_i32, %c0_i32_0 : i32, i32
  }
  func.func @transform_2(%arg0: i32) -> (i32, i32) {
    %c0_i32 = arith.constant 0 : i32
    %c0_i32_0 = arith.constant 0 : i32
    %c0_i32_1 = arith.constant 0 : i32
    return %c0_i32, %c0_i32_0 : i32, i32
  }
  func.func @transform_3(%arg0: i32) -> (i32, i32) {
    %c0_i32 = arith.constant 0 : i32
    %c0_i32_0 = arith.constant 0 : i32
    %c0_i32_1 = arith.constant 0 : i32
    return %c0_i32, %c0_i32_0 : i32, i32
  }
  func.func @transform_4(%arg0: i32) -> (i32, i32) {
    %c0_i32 = arith.constant 0 : i32
    %c0_i32_0 = arith.constant 0 : i32
    %c0_i32_1 = arith.constant 0 : i32
    return %c0_i32, %c0_i32_0 : i32, i32
  }
  func.func @transform_5(%arg0: i32) -> (i32, i32, i32) {
    %c0_i32 = arith.constant 0 : i32
    %c0_i32_0 = arith.constant 0 : i32
    %c0_i32_1 = arith.constant 0 : i32
    return %arg0, %c0_i32, %c0_i32_0 : i32, i32, i32
  }
  func.func @transform_6(%arg0: i32) -> (i32, i32, i32) {
    %c0_i32 = arith.constant 0 : i32
    %c0_i32_0 = arith.constant 0 : i32
    %c0_i32_1 = arith.constant 0 : i32
    return %arg0, %c0_i32, %c0_i32_0 : i32, i32, i32
  }
  func.func @transform_7(%arg0: i32) -> (i32, i32, i32) {
    %c0_i32 = arith.constant 0 : i32
    %c0_i32_0 = arith.constant 0 : i32
    %c0_i32_1 = arith.constant 0 : i32
    return %arg0, %c0_i32, %c0_i32_0 : i32, i32, i32
  }
}

</mosaic_0001>

<bundles_post_ra>
// kernel: tpu_custom_call.1
= control target key start
LH: loop header
LB: loop body
LE: loop exit
PB: predicated region body
PF: predicated region fallthrough
CT: control target
= control target key end

     0   :  { %13 = vsyncpa [#allocation5], 0  ;;  %s1148_s0 = inlined_call_operand.hbm [shape: f32[2,8,256], index: 0, kind: input, shape index: {}]   ;;  %s1149_s1 = inlined_call_operand.vmem [shape: f32[8,72], index: 1, kind: input, shape index: {}]   ;;  %s1150_s2 = inlined_call_operand.vmem [shape: f32[8,1], index: 2, kind: input, shape index: {}]   ;;  %s1151_s3 = inlined_call_operand.vmem [shape: f32[1,256], index: 3, kind: input, shape index: {}]   ;;  %s1152_s4 = inlined_call_operand.vmem [shape: f32[1,256], index: 4, kind: input, shape index: {}]   ;;  %s1153_s5 = inlined_call_operand.hbm [shape: f32[2,8,256], index: 5, kind: output, shape index: {0}]   ;;  %s1154_s6 = inlined_call_operand.vmem [shape: f32[1,8,1], index: 6, kind: output, shape index: {1}]   ;;  %s1155_s7 = inlined_call_operand.vmem [shape: f32[1,8,1], index: 7, kind: output, shape index: {2}]  }
   0x1   :  { %14 = vsyncpa [#allocation6], 0  ;;  %s894_s24 = smov [#allocation4]   ;;  %s846_s28 = scalar_lea.hbm %s1148_s0, 512 }
   0x2   :  { %s20_s25 = sshll.u32 %s894_s24, 4  ;;  %p847_p0 = scmp.ne.s32.totalorder %s1148_s0, %s846_s28  ;;  %s21_s25 = int_to_ptr.vmem [resolvable:$true] %s20_s25 }
   0x3   :  { %p850_p1 = scmp.lt.u32.totalorder %s846_s28, %s1148_s0 }
   0x5   :  { %p852_p2 = pnand %p850_p1, %p847_p0 }
   0x7   :  { %855 = shalt.err (!%p852_p2)
}
   0x8   :  { %s856_s10 = scalar_lea.vmem %s21_s25, 512  ;;  %p861_p4 = scmp.lt.s32.totalorder %s21_s25, %s21_s25 }
   0x9   :  { %p857_p3 = scmp.ne.s32.totalorder %s21_s25, %s856_s10  ;;  %p862_p5 = scmp.lt.s32.totalorder %s856_s10, %s856_s10 }
   0xb   :  { %p863_p6 = por %p862_p5, %p861_p4 }
   0xd   :  { %p864_p7 = pnand %p863_p6, %p857_p3 }
   0xf   :  { %867 = shalt.err (!%p864_p7)
}
  0x10   :  { %s895_s11 = smov 256   ;;  %s896_s12 = smov 16  }
  0x11   :  { %26 = dma.hbm_to_vmem [thread:$0]  %s1148_s0, 512, %s21_s25, [#allocation5], %s895_s11, %s895_s11, %s896_s12  }
  0x12   :  { %890 = dma.done.wait [#allocation5], 512  }
  0x13   :  { %891 = vsyncadd [#allocation5], 4294966784  ;;  %v50_v0 = vlaneseq  ;;  %v897_v1 = vmov 0.0   ;;  %v39_v5 = vld [vmem:[%s1152_s4] sm:$0x3]  ;;  %s898_s0 = smov 113  }
  0x14   :  { %568 = vmatprep.mubr.f32.mxu0 %v897_v1  ;;  %639 = vmatprep.mubr.f32.mxu1 %v897_v1  ;;  %v38_v6 = vld [vmem:[%s1151_s3] sm:$0x3]  ;;  %s899_s19 = smov 111   ;;  %s900_s20 = smov 127   ;;  %v978_v11 = vld [vmem:[#allocation4 + $0x8] sm:$0xff]  ;;  %v987_v15 = vld [vmem:[#allocation4 + $0x10] sm:$0xff] }
  0x15   :  { %v51_v2 = vshrl.u32 %v50_v0, 7  ;;  %s901_s3 = smov 1   ;;  %s902_s4 = smov 15   ;;  %v980_v12 = vld [vmem:[#allocation4] sm:$0xff]  ;;  %v754_v13 = vpack.i.bf16 %v897_v1, %v978_v11  ;;  %v989_v16 = vld [vmem:[#allocation4 + $0x18] sm:$0xff]  ;;  %v996_v18 = vpack.i.bf16 %v987_v15, %v897_v1  ;;  %vm62_vm0 = vcmask 908288  }
  0x16   :  { %s903_s21 = smov 17   ;;  %v739_v14 = vpack.i.bf16 %v978_v11, %v980_v12  ;;  %s904_s22 = smov 112   ;;  %v759_v17 = vpack.i.bf16 %v989_v16, %v980_v12  ;;  %v749_v19 = vpack.i.bf16 %v897_v1, %v989_v16  ;;  %vm152_vm1 = vcmask 1039360  }
  0x17   :  { %v52_v3 = vsub.s32 0, %v51_v2  ;;  %v56_v4 = vsub.s32 1, %v51_v2  ;;  %vm121_vm2 = vcmask 924672   ;;  %vm169_vm3 = vcmask 7168  }
  0x18   :  { %vm138_vm4 = vcmask 121856   ;;  %vm79_vm5 = vcmask 138240   ;;  %vm98_vm6 = vcmask 130048   ;;  %vm250_vm7 = vcmask 916480  }
  0x19   :  { %v112_v7 = vrot.slane %v39_v5, %v52_v3  ;;  %v53_v8 = vrot.slane %v38_v6, %v52_v3  ;;  %v116_v9 = vrot.slane %v39_v5, %v56_v4  ;;  %v57_v10 = vrot.slane %v38_v6, %v56_v4 }
  0x1a   :  { %vm500_vm8 = vcmask 588800  }
  0x1b   :  { %117 = vrot.lane.b32.xlu1 %v112_v7, %s898_s0  ;;  %58 = vrot.lane.b32.xlu0 %v53_v8, %s899_s19 }
  0x1f   :  { %119 = vrot.lane.b32.xlu1 %v116_v9, %s898_s0  ;;  %60 = vrot.lane.b32.xlu0 %v57_v10, %s899_s19 }
  0x23   :  { %150 = vrot.lane.b32.xlu1 %v57_v10, %s900_s20  ;;  %148 = vrot.lane.b32.xlu0 %v53_v8, %s900_s20 }
  0x27   :  { %185 = vrot.lane.b32.xlu1 %v116_v9, %s901_s3  ;;  %183 = vrot.lane.b32.xlu0 %v112_v7, %s901_s3 }
  0x2b   :  { %214 = vrot.lane.b32.xlu1 %v57_v10, %s902_s4  ;;  %212 = vrot.lane.b32.xlu0 %v53_v8, %s902_s4 }
  0x2f   :  { %262 = vrot.lane.b32.xlu1 %v116_v9, %s903_s21  ;;  %260 = vrot.lane.b32.xlu0 %v112_v7, %s903_s21 }
  0x33   :  { %755 = vrot.lane.b32.xlu0 %v754_v13, %s904_s22  ;;  %740 = vrot.lane.b32.xlu1 %v739_v14, %s896_s12 }
  0x37   :  { %760 = vrot.lane.b32.xlu0 %v759_v17, %s904_s22  ;;  %745 = vrot.lane.b32.xlu1 %v996_v18, %s896_s12 }
  0x3b   :  { %750 = vrot.lane.b32.xlu1 %v749_v19, %s896_s12 }
  0x8d   :  { %v118_v20 = vpop.permute.xlu1 %117  ;;  %v59_v21 = vpop.permute.xlu0 %58 }
  0x8e   :  { %v67_v25 = vmul.f32 0.0, %v59_v21  ;;  %v126_v33 = vmul.f32 0.0, %v118_v20 }
  0x91   :  { %v120_v22 = vpop.permute.xlu1 %119  ;;  %v61_v23 = vpop.permute.xlu0 %60 }
  0x92   :  { %v296_v24 = vmul.f32 %v989_v16, %v61_v23  ;;  %v335_v30 = vmul.f32 %v989_v16, %v120_v22  ;;  %v63_v39 = vsel %vm62_vm0, %v59_v21, %v61_v23  ;;  %v69_v47 = vmul.f32 %v61_v23, %v978_v11 }
  0x93   :  { %v68_v46 = vmul.f32 %v63_v39, %v980_v12  ;;  %v295_v51 = vmul.f32 %v987_v15, %v63_v39  ;;  %v122_v53 = vsel %vm121_vm2, %v118_v20, %v120_v22  ;;  %v128_v57 = vmul.f32 %v120_v22, %v978_v11 }
  0x94   :  { %v764_v31 = vpack.i.bf16 %v67_v25, %v296_v24  ;;  %v769_v38 = vpack.i.bf16 %v126_v33, %v335_v30  ;;  %v127_v56 = vmul.f32 %v122_v53, %v980_v12  ;;  %v334_v63 = vmul.f32 %v987_v15, %v122_v53 }
  0x95   :  { %v151_v26 = vpop.permute.xlu1 %150  ;;  %v149_v27 = vpop.permute.xlu0 %148  ;;  %v789_v52 = vpack.i.bf16 %v69_v47, %v68_v46  ;;  %v794_v58 = vpack.i.bf16 %v295_v51, %v67_v25  ;;  %v905_v21 = vmov 0  }
  0x96   :  { %v356_v28 = vmul.f32 %v989_v16, %v151_v26  ;;  %v157_v29 = vmul.f32 0.0, %v149_v27  ;;  %765 = vrot.lane.b32.xlu0 %v764_v31, %s903_s21  ;;  %v153_v40 = vsel %vm152_vm1, %v149_v27, %v151_v26  ;;  %v159_v48 = vmul.f32 %v151_v26, %v978_v11  ;;  %844 = vset.pattern.permute.xlu1 %v905_v21 }
  0x97   :  { %v158_v49 = vmul.f32 %v153_v40, %v980_v12  ;;  %v355_v54 = vmul.f32 %v987_v15, %v153_v40  ;;  %v799_v0 = vpack.i.bf16 %v128_v57, %v127_v56  ;;  %v809_v5 = vpack.i.bf16 %v334_v63, %v126_v33  ;;  %845 = vset.pattern.permute.xlu0 %v905_v21 }
  0x98   :  { %v774_v32 = vpack.i.bf16 %v157_v29, %v356_v28 }
  0x99   :  { %v186_v34 = vpop.permute.xlu1 %185  ;;  %v184_v35 = vpop.permute.xlu0 %183  ;;  %v804_v55 = vpack.i.bf16 %v159_v48, %v158_v49  ;;  %v814_v60 = vpack.i.bf16 %v355_v54, %v157_v29 }
  0x9a   :  { %v193_v36 = vmul.f32 0.0, %v186_v34  ;;  %v379_v37 = vmul.f32 %v987_v15, %v184_v35  ;;  %775 = vrot.lane.b32.xlu1 %v774_v32, %s901_s3  ;;  %770 = vrot.lane.b32.xlu0 %v769_v38, %s902_s4  ;;  %v187_v61 = vsel %vm169_vm3, %v184_v35, %v186_v34  ;;  %v191_v1 = vmul.f32 %v184_v35, %v980_v12 }
  0x9b   :  { %v380_v2 = vmul.f32 %v989_v16, %v187_v61  ;;  %v192_v4 = vmul.f32 %v187_v61, %v978_v11 }
  0x9c   :  { %v779_v43 = vpack.i.bf16 %v379_v37, %v193_v36 }
  0x9d   :  { %v215_v41 = vpop.permute.xlu1 %214  ;;  %v213_v42 = vpop.permute.xlu0 %212  ;;  %v829_v7 = vpack.i.bf16 %v380_v2, %v191_v1  ;;  %v819_v8 = vpack.i.bf16 %v193_v36, %v192_v4 }
  0x9e   :  { %v222_v44 = vmul.f32 0.0, %v215_v41  ;;  %v400_v45 = vmul.f32 %v987_v15, %v213_v42  ;;  %780 = vrot.lane.b32.xlu0 %v779_v43, %s900_s20  ;;  %v216_v3 = vsel %vm138_vm4, %v213_v42, %v215_v41  ;;  %v220_v9 = vmul.f32 %v213_v42, %v980_v12 }
  0x9f   :  { %v221_v6 = vmul.f32 %v216_v3, %v978_v11  ;;  %v401_v10 = vmul.f32 %v989_v16, %v216_v3 }
  0xa0   :  { %v784_v50 = vpack.i.bf16 %v400_v45, %v222_v44 }
  0xa1   :  { %v261_v59 = vpop.permute.xlu0 %260  ;;  %v834_v13 = vpack.i.bf16 %v222_v44, %v221_v6  ;;  %v263_v14 = vpop.permute.xlu1 %262  ;;  %v839_v17 = vpack.i.bf16 %v401_v10, %v220_v9 }
  0xa2   :  { %785 = vrot.lane.b32.xlu1 %v784_v50, %s898_s0  ;;  %790 = vrot.lane.b32.xlu0 %v789_v52, %s903_s21  ;;  %v268_v62 = vmul.f32 %v261_v59, %v980_v12  ;;  %v270_v19 = vmul.f32 0.0, %v263_v14  ;;  %v264_v20 = vsel %vm79_vm5, %v261_v59, %v263_v14  ;;  %v439_v24 = vmul.f32 %v987_v15, %v261_v59 }
  0xa3   :  { %v269_v22 = vmul.f32 %v264_v20, %v978_v11  ;;  %v440_v23 = vmul.f32 %v989_v16, %v264_v20 }
  0xa5   :  { %v741_v25 = vpop.permute.xlu1 %740  ;;  %v1059_v26 = vpop.permute.xlu0 %755 }
  0xa6   :  { %805 = vrot.lane.b32.xlu1 %v804_v55, %s901_s3  ;;  %795 = vrot.lane.b32.xlu0 %v794_v58, %s903_s21  ;;  %v743_v35 = vunpack.i.h.bf16 %v741_v25  ;;  %v742_v36 = vunpack.i.l.bf16 %v741_v25 }
  0xa8   :  { %v100_v46 = vsel %vm98_vm6, %v742_v36, %v743_v35 }
  0xa9   :  { %v746_v27 = vpop.permute.xlu1 %745  ;;  %v1061_v28 = vpop.permute.xlu0 %760 }
  0xaa   :  { %815 = vrot.lane.b32.xlu1 %v814_v60, %s901_s3  ;;  %800 = vrot.lane.b32.xlu0 %v799_v0, %s902_s4  ;;  %v748_v41 = vunpack.i.h.bf16 %v746_v27  ;;  %v747_v42 = vunpack.i.l.bf16 %v746_v27 }
  0xac   :  { %v99_v55 = vsel %vm98_vm6, %v747_v42, %v742_v36 }
  0xad   :  { %v751_v29 = vpop.permute.xlu1 %750 }
  0xae   :  { %274 = vrot.lane.b32.xlu1 %v268_v62, %s899_s19  ;;  %810 = vrot.lane.b32.xlu0 %v809_v5, %s902_s4  ;;  %v753_v43 = vunpack.i.h.bf16 %v751_v29  ;;  %v752_v44 = vunpack.i.l.bf16 %v751_v29  ;;  %v758_v5 = vunpack.i.h.bf16 %v1059_v26 }
  0xb0   :  { %v325_v56 = vsel %vm98_vm6, %v748_v41, %v752_v44  ;;  %v324_v57 = vsel %vm98_vm6, %v753_v43, %v748_v41 }
  0xb2   :  { %830 = vrot.lane.b32.xlu1 %v829_v7, %s900_s20  ;;  %820 = vrot.lane.b32.xlu0 %v819_v8, %s900_s20  ;;  %v757_v8 = vunpack.i.l.bf16 %v1059_v26 }
  0xb6   :  { %835 = vrot.lane.b32.xlu1 %v834_v13, %s898_s0  ;;  %825 = vrot.lane.b32.xlu0 %v996_v18, %s904_s22  ;;  %v494_v18 = vld [vmem:[%s1150_s2] sm:$0xff] }
  0xba   :  { %840 = vrot.lane.b32.xlu1 %v839_v17, %s898_s0  ;;  %278 = vrot.lane.b32.xlu0 %v270_v19, %s899_s19 }
  0xbe   :  { %276 = vrot.lane.b32.xlu1 %v269_v22, %s899_s19  ;;  %447 = vrot.lane.b32.xlu0 %v440_v23, %s899_s19 }
  0xc2   :  { %449 = vrot.lane.b32.xlu1 %v270_v19, %s899_s19  ;;  %445 = vrot.lane.b32.xlu0 %v439_v24, %s899_s19 }
  0xc6   :  { %497 = vperm.xlu1 %844, %v494_v18  }
 0x108   :  { %v766_v30 = vpop.permute.xlu0 %765 }
 0x109   :  { %v768_v49 = vunpack.i.h.bf16 %v766_v30  ;;  %v767_v50 = vunpack.i.l.bf16 %v766_v30 }
 0x10c   :  { %v1063_v31 = vpop.permute.xlu0 %770  ;;  %v1065_v32 = vpop.permute.xlu1 %775 }
 0x10d   :  { %v778_v9 = vunpack.i.h.bf16 %v1065_v32  ;;  %v777_v14 = vunpack.i.l.bf16 %v1065_v32  ;;  %v773_v17 = vunpack.i.h.bf16 %v1063_v31  ;;  %v772_v19 = vunpack.i.l.bf16 %v1063_v31 }
 0x110   :  { %v1067_v33 = vpop.permute.xlu0 %780 }
 0x111   :  { %v783_v22 = vunpack.i.h.bf16 %v1067_v33  ;;  %v782_v23 = vunpack.i.l.bf16 %v1067_v33 }
 0x114   :  { %v1069_v34 = vpop.permute.xlu1 %785  ;;  %v791_v37 = vpop.permute.xlu0 %790 }
 0x115   :  { %v793_v38 = vunpack.i.h.bf16 %v791_v37  ;;  %v792_v39 = vunpack.i.l.bf16 %v791_v37 }
 0x117   :  { %v81_v45 = vsel %vm79_vm5, %v792_v39, %v793_v38 }
 0x118   :  { %v806_v40 = vpop.permute.xlu1 %805  ;;  %v796_v47 = vpop.permute.xlu0 %795  ;;  %v694_v48 = vpack.c.bf16 %v100_v46, %v81_v45 }
 0x119   :  { %v798_v51 = vunpack.i.h.bf16 %v796_v47  ;;  %v797_v52 = vunpack.i.l.bf16 %v796_v47  ;;  %v808_v54 = vunpack.i.h.bf16 %v806_v40  ;;  %v807_v58 = vunpack.i.l.bf16 %v806_v40 }
 0x11a   :  { %695 = vmatprep.subr.bf16.mxu0 %v694_v48  ;;  %v762_v48 = vunpack.i.l.bf16 %v1061_v28 }
 0x11b   :  { %v80_v59 = vsel %vm79_vm5, %v797_v52, %v792_v39  ;;  %v307_v60 = vsel %vm79_vm5, %v798_v51, %v767_v50  ;;  %v306_v61 = vsel %vm79_vm5, %v768_v49, %v798_v51  ;;  %v171_v13 = vsel %vm169_vm3, %v807_v58, %v808_v54 }
 0x11c   :  { %v816_v53 = vpop.permute.xlu1 %815  ;;  %v801_v62 = vpop.permute.xlu0 %800  ;;  %v696_v63 = vpack.c.bf16 %v99_v55, %v80_v59  ;;  %v710_v0 = vpack.c.bf16 %v325_v56, %v307_v60  ;;  %v712_v1 = vpack.c.bf16 %v324_v57, %v306_v61  ;;  %v252_v55 = vsel %vm250_vm7, %v757_v8, %v758_v5 }
 0x11d   :  { %v803_v2 = vunpack.i.h.bf16 %v801_v62  ;;  %v802_v3 = vunpack.i.l.bf16 %v801_v62  ;;  %v818_v6 = vunpack.i.h.bf16 %v816_v53  ;;  %v817_v7 = vunpack.i.l.bf16 %v816_v53 }
 0x11e   :  { %697 = vmatpush1.bf16.msra.mxu0 %v696_v63  ;;  %711 = vmatprep.subr.bf16.mxu1 %v710_v0  ;;  %v763_v56 = vunpack.i.h.bf16 %v1061_v28  ;;  %v788_v61 = vunpack.i.h.bf16 %v1069_v34 }
 0x11f   :  { %713 = vmatpush1.bf16.msra.mxu1 %v712_v1  ;;  %v140_v10 = vsel %vm138_vm4, %v802_v3, %v803_v2  ;;  %v170_v27 = vsel %vm169_vm3, %v817_v7, %v807_v58  ;;  %v367_v29 = vsel %vm169_vm3, %v818_v6, %v777_v14  ;;  %v366_v30 = vsel %vm169_vm3, %v778_v9, %v818_v6 }
 0x120   :  { %v1079_v4 = vpop.permute.xlu1 %274  ;;  %v811_v20 = vpop.permute.xlu0 %810  ;;  %v698_v21 = vpack.c.bf16 %v171_v13, %v140_v10  ;;  %v457_v13 = vld [vmem:[%s1149_s1] sm:$0xff]  ;;  %s906_s1 = smov [#allocation7]  }
 0x121   :  { %v813_v24 = vunpack.i.h.bf16 %v811_v20  ;;  %v812_v18 = vunpack.i.l.bf16 %v811_v20  ;;  %s672_s26 = sshll.u32 %s906_s1, 4  ;;  %s673_s26 = int_to_ptr.vmem [resolvable:$true] %s672_s26 }
 0x122   :  { %699 = vmatprep.subr.bf16.mxu0 %v698_v21  ;;  %s868_s27 = scalar_lea.vmem %s673_s26, 512  ;;  %p873_p9 = scmp.lt.s32.totalorder %s673_s26, %s673_s26 }
 0x123   :  { %v139_v31 = vsel %vm138_vm4, %v812_v18, %v802_v3  ;;  %v346_v35 = vsel %vm138_vm4, %v813_v24, %v772_v19  ;;  %v345_v36 = vsel %vm138_vm4, %v773_v17, %v813_v24  ;;  %p869_p8 = scmp.ne.s32.totalorder %s673_s26, %s868_s27  ;;  %p874_p10 = scmp.lt.s32.totalorder %s868_s27, %s868_s27 }
 0x124   :  { %v831_v25 = vpop.permute.xlu1 %830  ;;  %v821_v37 = vpop.permute.xlu0 %820  ;;  %v700_v33 = vpack.c.bf16 %v170_v27, %v139_v31  ;;  %v714_v38 = vpack.c.bf16 %v367_v29, %v346_v35  ;;  %v716_v39 = vpack.c.bf16 %v366_v30, %v345_v36 }
 0x125   :  { %v833_v26 = vunpack.i.h.bf16 %v831_v25  ;;  %v832_v32 = vunpack.i.l.bf16 %v831_v25  ;;  %v823_v41 = vunpack.i.h.bf16 %v821_v37  ;;  %v822_v42 = vunpack.i.l.bf16 %v821_v37  ;;  %p875_p11 = por %p874_p10, %p873_p9 }
 0x126   :  { %701 = vmatpush1.bf16.msra.mxu0 %v700_v33  ;;  %715 = vmatprep.subr.bf16.mxu1 %v714_v38 }
 0x127   :  { %v392_v40 = vsel %vm152_vm1, %v833_v26, %v782_v23  ;;  %v391_v45 = vsel %vm152_vm1, %v783_v22, %v833_v26  ;;  %717 = vmatpush1.bf16.msra.mxu1 %v716_v39  ;;  %v204_v49 = vsel %vm152_vm1, %v822_v42, %v823_v41  ;;  %v203_v50 = vsel %vm152_vm1, %v832_v32, %v822_v42  ;;  %p876_p12 = pnand %p875_p11, %p869_p8 }
 0x128   :  { %v836_v43 = vpop.permute.xlu1 %835  ;;  %v718_v44 = vpack.c.bf16 %v392_v40, %v989_v16  ;;  %v720_v51 = vpack.c.bf16 %v391_v45, %v987_v15  ;;  %v826_v52 = vpop.permute.xlu0 %825  ;;  %v702_v53 = vpack.c.bf16 %v204_v49, %v978_v11  ;;  %v704_v16 = vpack.c.bf16 %v203_v50, %v980_v12 }
 0x129   :  { %v838_v46 = vunpack.i.h.bf16 %v836_v43  ;;  %v837_v47 = vunpack.i.l.bf16 %v836_v43  ;;  %v828_v57 = vunpack.i.h.bf16 %v826_v52  ;;  %v827_v58 = vunpack.i.l.bf16 %v826_v52 }
 0x12a   :  { %719 = vmatprep.subr.bf16.mxu1 %v718_v44  ;;  %v787_v15 = vunpack.i.l.bf16 %v1069_v34  ;;  %703 = vmatprep.subr.bf16.mxu0 %v702_v53  ;;  %v251_v12 = vsel %vm250_vm7, %v762_v48, %v757_v8 }
 0x12b   :  { %v233_v54 = vsel %vm121_vm2, %v837_v47, %v838_v46  ;;  %705 = vmatpush1.bf16.msra.mxu0 %v704_v16  ;;  %721 = vmatpush1.bf16.msra.mxu1 %v720_v51  ;;  %v431_v63 = vsel %vm250_vm7, %v763_v56, %v827_v58  ;;  %v430_v3 = vsel %vm250_vm7, %v828_v57, %v763_v56 }
 0x12c   :  { %v841_v59 = vpop.permute.xlu1 %840  ;;  %v706_v60 = vpack.c.bf16 %v252_v55, %v233_v54  ;;  %v279_v0 = vpop.permute.xlu0 %278 }
 0x12d   :  { %v843_v62 = vunpack.i.h.bf16 %v841_v59  ;;  %v842_v11 = vunpack.i.l.bf16 %v841_v59 }
 0x12e   :  { %707 = vmatprep.subr.bf16.mxu0 %v706_v60 }
 0x12f   :  { %v232_v28 = vsel %vm121_vm2, %v842_v11, %v837_v47  ;;  %v413_v1 = vsel %vm121_vm2, %v843_v62, %v787_v15  ;;  %v412_v2 = vsel %vm121_vm2, %v788_v61, %v843_v62 }
 0x130   :  { %v277_v34 = vpop.permute.xlu1 %276  ;;  %v708_v5 = vpack.c.bf16 %v251_v12, %v232_v28  ;;  %v722_v6 = vpack.c.bf16 %v431_v63, %v413_v1  ;;  %v724_v7 = vpack.c.bf16 %v430_v3, %v412_v2  ;;  %v448_v8 = vpop.permute.xlu0 %447 }
 0x131   :  { %v281_v9 = vsel %vm62_vm0, %v277_v34, %v279_v0  ;;  %v280_v14 = vsel %vm62_vm0, %v1079_v4, %v277_v34 }
 0x132   :  { %709 = vmatpush1.bf16.msra.mxu0 %v708_v5  ;;  %723 = vmatprep.subr.bf16.mxu1 %v722_v6 }
 0x133   :  { %520 = vmatprep.subr.mxu0 %v281_v9  ;;  %725 = vmatpush1.bf16.msra.mxu1 %v724_v7 }
 0x134   :  { %v450_v10 = vpop.permute.xlu1 %449  ;;  %v446_v19 = vpop.permute.xlu0 %445 }
 0x135   :  { %v452_v17 = vsel %vm62_vm0, %v448_v8, %v450_v10  ;;  %v451_v20 = vsel %vm62_vm0, %v446_v19, %v448_v8 }
 0x136   :  { %521 = vmatpush1.msra.mxu0 %v280_v14  ;;  %591 = vmatprep.subr.mxu1 %v452_v17 }
 0x137   :  { %692 = vmatmul.mubr.msk.f32.vlgmr.msra.gmra.mrb[0].mxu0 %vm500_vm8, %v457_v13  ;;  %592 = vmatpush1.msra.mxu1 %v451_v20 }
 0x138   :  { %693 = vmatmul.mubr.msk.f32.vlgmr.msra.gmra.mrb[0].mxu1 %vm500_vm8, %v457_v13 }
 0x145   :  { %v498_v21 = vpop.permute.xlu1 %497 }
 0x20a   :  { %v570_v22 = vpop.f32.mrb[0].mxu0 }
 0x20b   :  { %v571_v23 = vadd.f32 %v570_v22, %v498_v21  ;;  %v572_v24 = vpop.f32.mrb[1].mxu0  ;;  %v641_v26 = vpop.f32.mrb[0].mxu1 }
 0x20c   :  { %v573_v18 = vadd.f32 %v572_v24, %v498_v21  ;;  %v642_v29 = vadd.f32 %v641_v26, %v498_v21  ;;  %v643_v30 = vpop.f32.mrb[1].mxu1 }
 0x20d   :  { %646 = vst [vmem:[#allocation7] sm:$0xff] %v571_v23  ;;  %v657_v25 = vmul.f32 %v571_v23, %v571_v23  ;;  %v644_v32 = vadd.f32 %v643_v30, %v498_v21 }
 0x20e   :  { %647 = vst [vmem:[#allocation7 + $0x8] sm:$0xff] %v573_v18  ;;  %v651_v4 = vadd.f32 %v573_v18, %v571_v23  ;;  %v658_v27 = vmul.f32 %v573_v18, %v573_v18  ;;  %649 = vst [vmem:[#allocation7 + $0x10] sm:$0xff] %v642_v29  ;;  %v659_v31 = vmul.f32 %v642_v29, %v642_v29 }
 0x20f   :  { %650 = vst [vmem:[#allocation7 + $0x18] sm:$0xff] %v644_v32  ;;  %v660_v33 = vmul.f32 %v644_v32, %v644_v32 }
 0x210   :  { %v652_v35 = vadd.f32 %v651_v4, %v642_v29  ;;  %v661_v36 = vadd.f32 %v658_v27, %v657_v25 }
 0x212   :  { %v653_v37 = vadd.f32 %v652_v35, %v644_v32  ;;  %v662_v38 = vadd.f32 %v661_v36, %v659_v31 }
 0x214   :  { %654 = vadd.xlane.f32.xlu0 %v653_v37  ;;  %v663_v39 = vadd.f32 %v662_v38, %v660_v33 }
 0x216   :  { %664 = vadd.xlane.f32.xlu1 %v663_v39 }
 0x217   :  { %879 = shalt.err (!%p876_p12)
}
 0x218   :  { %s880_s30 = scalar_lea.hbm %s1153_s5, 512 }
 0x219   :  { %p881_p13 = scmp.ne.s32.totalorder %s1153_s5, %s880_s30  ;;  %p884_p0 = scmp.lt.u32.totalorder %s880_s30, %s1153_s5 }
 0x21b   :  { %p886_p1 = pnand %p884_p0, %p881_p13 }
 0x21d   :  { %889 = shalt.err (!%p886_p1)
}
 0x21e   :  { %678 = dma.vmem_to_hbm [thread:$0]  %s673_s26, 512, %s1153_s5, [#allocation6], %s895_s11, %s895_s11, %s896_s12  }
 0x2a1   :  { %v655_v40 = vpop.xlane.xlu0 %654 }
 0x2a2   :  { %656 = vst.msk [vmem:[%s1154_s6] sm:$0xff] %vm169_vm3, %v655_v40 }
 0x2a3   :  { %v665_v41 = vpop.xlane.xlu1 %664 }
 0x2a4   :  { %666 = vst.msk [vmem:[%s1155_s7] sm:$0xff] %vm169_vm3, %v665_v41 }
 0x2a5   :  { %892 = dma.done.wait [#allocation6], 512  }
 0x2a6   :  { %893 = vsyncadd [#allocation6], 4294966784 }
 0x2a7   :  { %690 = vsyncpa [#allocation5], 1 }
 0x2a8   :  { %691 = vsyncpa [#allocation6], 1 }

</bundles_post_ra>
